<compile_context>
chip_gen: v6e
topology: v6e:2x2x1
jax: 0.10.0
libtpu: 0.0.40
codegen_flags: <defaults>
</compile_context>

<pallas_src>
import math
import numpy as np
import jax
import jax.numpy as jnp
from jax import lax
from jax.experimental import pallas as pl
from jax.experimental.pallas import tpu as pltpu


def _round_up(x, m):
    return (x + m - 1) // m * m


def _tile_heads(x, n):
    # sublane-axis repeat (replacement for deprecated pltpu.repeat)
    return x if n == 1 else jnp.concatenate([x] * n, axis=0)


def _make_kernel(Bt, L_pad, S_pad, n_heads, head_dim, use_cat, out_dtype):
    D = n_heads * head_dim
    bf16 = jnp.bfloat16
    f32 = jnp.float32

    def kernel(natoms_ref, h_ref, rf_ref, mask_ref,
               wq_ref, bq_ref, wk_ref, bk_ref, wv_ref, bv_ref,
               wattn_ref, *rest):
        if use_cat:
            wh_ref, bout_ref, out_ref, q_scr, k_scr, v_scr = rest
        else:
            bout_ref, out_ref, q_scr, k_scr, v_scr = rest

        tile = pl.program_id(0)
        hq = h_ref[...]                                   # [Bt*Lp, D] bf16 padded queries
        rf = rf_ref[...]                                  # [Bt*Sp, R] bf16 retrieval feats

        # ---- shared, lane-dense projections over the whole packed tile (MXU) ----
        # scale (1/sqrt(hd)) is folded into wq/bq; linear_query folded into wk/wv.
        q_scr[...] = (jnp.dot(hq, wq_ref[...], preferred_element_type=f32)
                      + bq_ref[...]).astype(bf16)
        k_scr[...] = (jnp.dot(rf, wk_ref[...], preferred_element_type=f32)
                      + bk_ref[...]).astype(bf16)
        v_scr[...] = (jnp.dot(rf, wv_ref[...], preferred_element_type=f32)
                      + bv_ref[...]).astype(bf16)

        # ---- base (h-path of fused linear_cat + fused bias) straight into out ----
        if use_cat:
            base = jnp.dot(hq, wh_ref[...], preferred_element_type=f32) + bout_ref[...]
        else:
            base = jnp.broadcast_to(bout_ref[...], (Bt * L_pad, D))
        out_ref[...] = base.astype(out_dtype)             # covers skipped (padding) graphs

        # ---- per-graph attention, all heads batched into lane-dense matmuls ----
        def body(g, carry):
            @pl.when(natoms_ref[tile * Bt + g] > 0)
            def _():
                qo = pl.multiple_of(g * L_pad, L_pad)
                ko = pl.multiple_of(g * S_pad, S_pad)
                q_g = q_scr[pl.ds(qo, L_pad), :]          # [Lp, D]  bf16
                k_g = k_scr[pl.ds(ko, S_pad), :]          # [Sp, D]  bf16
                v_g = v_scr[pl.ds(ko, S_pad), :]          # [Sp, D]  bf16
                hm = mask_ref[...]                        # [H*Sp, D] bf16 head+key mask

                # block-diagonal expansion: row j <-> (head j//Sp, key j%Sp),
                # masked to its own head's columns (and to real keys < S).
                k_exp = _tile_heads(k_g, n_heads) * hm    # [H*Sp, D]
                v_exp = _tile_heads(v_g, n_heads) * hm    # [H*Sp, D]

                # one full-D-contraction matmul -> scores for every head at once
                s = lax.dot_general(q_g, k_exp, (((1,), (1,)), ((), ())),
                                    preferred_element_type=f32)      # [Lp, H*Sp]
                m = jnp.max(s, axis=-1, keepdims=True)    # shared (per-row) max shift
                p = jnp.exp(s - m).astype(bf16)           # [Lp, H*Sp]

                # un-normalized context and per-head softmax denominator,
                # both as lane-dense [Lp, D] matmuls (no head reshapes/slices).
                ctx = jnp.dot(p, v_exp, preferred_element_type=f32)  # [Lp, D]
                den = jnp.dot(p, hm, preferred_element_type=f32)     # [Lp, D]
                o = (ctx * pl.reciprocal(jnp.maximum(den, 1e-30), approx=True)
                     ).astype(bf16)

                # heads already laid out along D -> fused (W_o @ W_cat) projection
                contrib = jnp.dot(o, wattn_ref[...], preferred_element_type=f32)
                out_ref[pl.ds(qo, L_pad), :] = (
                    out_ref[pl.ds(qo, L_pad), :].astype(f32) + contrib
                ).astype(out_dtype)
            return carry

        lax.fori_loop(0, Bt, body, 0)

    return kernel


def init_params(key, h_dim, ret_feat_dim):
    ks = jax.random.split(key, 12)
    scale = 0.1
    return {
        # linear_query: Linear(ret_feat_dim, h_dim)
        'w_lq': jax.random.normal(ks[0], (h_dim, ret_feat_dim), jnp.float32) * scale,
        'b_lq': jax.random.normal(ks[1], (h_dim,), jnp.float32) * scale,
        # MultiheadAttention in_proj (q, k, v) and out_proj
        'w_q': jax.random.normal(ks[2], (h_dim, h_dim), jnp.float32) * scale,
        'b_q': jax.random.normal(ks[3], (h_dim,), jnp.float32) * scale,
        'w_k': jax.random.normal(ks[4], (h_dim, h_dim), jnp.float32) * scale,
        'b_k': jax.random.normal(ks[5], (h_dim,), jnp.float32) * scale,
        'w_v': jax.random.normal(ks[6], (h_dim, h_dim), jnp.float32) * scale,
        'b_v': jax.random.normal(ks[7], (h_dim,), jnp.float32) * scale,
        'w_o': jax.random.normal(ks[8], (h_dim, h_dim), jnp.float32) * scale,
        'b_o': jax.random.normal(ks[9], (h_dim,), jnp.float32) * scale,
        # linear_cat: Linear(2*h_dim, h_dim)
        'w_cat': jax.random.normal(ks[10], (h_dim, 2 * h_dim), jnp.float32) * scale,
        'b_cat': jax.random.normal(ks[11], (h_dim,), jnp.float32) * scale,
    }


def cross_attention_core(h, ret_feat, batch, params, n_heads,
                         fusion_type='xattn_cat', mask_ligand=None,
                         target_rows=512):
    """JAX/Pallas equivalent of CrossAttentionCore.forward (mask_ligand unused, as in PyTorch)."""
    del mask_ligand  # unused in the PyTorch forward as well
    h = jnp.asarray(h, jnp.float32)
    ret_feat = jnp.asarray(ret_feat, jnp.float32)
    D = h.shape[1]
    assert D % n_heads == 0
    head_dim = D // n_heads
    use_cat = (fusion_type == 'xattn_cat')
    scale = 1.0 / math.sqrt(head_dim)

    # ---- host-side flat-graph -> padded-dense bookkeeping (torch bincount/split/stack)
    # TODO(synk): host-side numpy on `batch` makes this wrapper non-jittable w.r.t. a traced batch.
    batch_np = np.asarray(batch)
    B = int(batch_np.max()) + 1
    counts = np.bincount(batch_np, minlength=B)
    L = int(counts.max())
    L_pad = _round_up(L, 8)                       # sublane-aligned per-graph row stride

    Bs, S, R = ret_feat.shape
    assert Bs == B
    S_pad = _round_up(S, 8)

    # pack Bt graphs per grid step so shared projections see >= target_rows rows
    Bt = max(1, min(B, -(-target_rows // L_pad)))
    n_tiles = -(-B // Bt)
    # prefer >=2 grid tiles (megacore / dual-TC v7x) when tiles stay MXU-sized
    if n_tiles == 1 and B > 1 and B * L_pad >= 512:
        Bt = -(-B // 2)
        n_tiles = 2
    B_pad = n_tiles * Bt

    offsets = np.concatenate([[0], np.cumsum(counts)[:-1]])
    row_in_batch = np.arange(batch_np.shape[0]) - offsets[batch_np]
    flat_idx = jnp.asarray((batch_np * L_pad + row_in_batch).astype(np.int32))

    h_flat = jnp.zeros((B_pad * L_pad, D), jnp.bfloat16)
    h_flat = h_flat.at[flat_idx].set(h.astype(jnp.bfloat16))

    rf_pad = jnp.zeros((B_pad, S_pad, R), jnp.bfloat16)
    rf_pad = rf_pad.at[:B, :S, :].set(ret_feat.astype(jnp.bfloat16))
    rf_flat = rf_pad.reshape(B_pad * S_pad, R)

    natoms = np.zeros((B_pad,), np.int32)
    natoms[:B] = counts
    natoms = jnp.asarray(natoms)

    # combined head + key-padding mask: row j (= head j//S_pad, key j%S_pad) keeps
    # only its own head's columns, and only if the key index is a real key (< S).
    HSp = n_heads * S_pad
    hm_np = np.zeros((HSp, D), np.float32)
    for hh in range(n_heads):
        hm_np[hh * S_pad: hh * S_pad + S, hh * head_dim:(hh + 1) * head_dim] = 1.0
    head_mask = jnp.asarray(hm_np, jnp.bfloat16)

    # ---- host-side algebraic weight fusion (f32 math, single cast to bf16) --------
    f32 = jnp.float32
    WqT = jnp.asarray(params['w_q'], f32).T
    WkT = jnp.asarray(params['w_k'], f32).T
    WvT = jnp.asarray(params['w_v'], f32).T
    WoT = jnp.asarray(params['w_o'], f32).T
    WlqT = jnp.asarray(params['w_lq'], f32).T
    b_lq = jnp.asarray(params['b_lq'], f32)
    b_q = jnp.asarray(params['b_q'], f32)
    b_k = jnp.asarray(params['b_k'], f32)
    b_v = jnp.asarray(params['b_v'], f32)
    b_o = jnp.asarray(params['b_o'], f32)

    w_q_f = WqT * scale                                   # 1/sqrt(hd) folded into Q proj
    b_q_f = (b_q * scale)[None, :]
    w_k_f = WlqT @ WkT                                    # linear_query folded into K proj
    b_k_f = (b_lq @ WkT + b_k)[None, :]
    w_v_f = WlqT @ WvT                                    # linear_query folded into V proj
    b_v_f = (b_lq @ WvT + b_v)[None, :]

    if use_cat:
        WcatT = jnp.asarray(params['w_cat'], f32).T       # [2D, D]
        b_cat = jnp.asarray(params['b_cat'], f32)
        w_h = WcatT[:D, :]                                # h-path of linear_cat
        w_attn = WoT @ WcatT[D:, :]                       # W_o folded into linear_cat
        b_out = (b_o @ WcatT[D:, :] + b_cat)[None, :]
    else:
        w_h = None
        w_attn = WoT
        b_out = b_o[None, :]

    bf = jnp.bfloat16
    w_args = [head_mask, w_q_f.astype(bf), b_q_f, w_k_f.astype(bf), b_k_f,
              w_v_f.astype(bf), b_v_f, w_attn.astype(bf)]
    if use_cat:
        w_args.append(w_h.astype(bf))
    w_args.append(b_out)

    def const_spec(a):
        # grid-invariant operand: constant block index, full-array block
        return pl.BlockSpec(a.shape, lambda t, n: (0, 0))

    in_specs = ([pl.BlockSpec((Bt * L_pad, D), lambda t, n: (t, 0)),
                 pl.BlockSpec((Bt * S_pad, R), lambda t, n: (t, 0))]
                + [const_spec(a) for a in w_args])
    out_spec = pl.BlockSpec((Bt * L_pad, D), lambda t, n: (t, 0))

    grid_spec = pltpu.PrefetchScalarGridSpec(
        num_scalar_prefetch=1,
        grid=(n_tiles,),
        in_specs=in_specs,
        out_specs=out_spec,
        scratch_shapes=[pltpu.VMEM((Bt * L_pad, D), jnp.bfloat16),   # q
                        pltpu.VMEM((Bt * S_pad, D), jnp.bfloat16),   # k
                        pltpu.VMEM((Bt * S_pad, D), jnp.bfloat16)],  # v
    )

    # advisory cost estimate so XLA schedules the surrounding scatter/gather well
    flops = 2 * B_pad * L_pad * D * D + 2 * 2 * B_pad * S_pad * R * D
    if use_cat:
        flops += 2 * B_pad * L_pad * D * D
    flops += B * (3 * 2 * L_pad * HSp * D + 2 * L_pad * D * D)
    bytes_accessed = (2 * (B_pad * L_pad * D * 2 + B_pad * S_pad * R)
                      + 2 * sum(int(np.prod(a.shape)) for a in w_args))
    cost = pl.CostEstimate(flops=int(flops),
                           transcendentals=int(B * L_pad * HSp),
                           bytes_accessed=int(bytes_accessed))

    out_flat = pl.pallas_call(
        _make_kernel(Bt, L_pad, S_pad, n_heads, head_dim, use_cat, jnp.bfloat16),
        out_shape=jax.ShapeDtypeStruct((B_pad * L_pad, D), jnp.bfloat16),
        grid_spec=grid_spec,
        compiler_params=pltpu.CompilerParams(
            dimension_semantics=("parallel",),
            vmem_limit_bytes=64 * 1024 * 1024),
        cost_estimate=cost,
    )(natoms, h_flat, rf_flat, *w_args)

    # gather valid (non-padded) rows — equivalent to attention_output[~mask]
    out = out_flat[flat_idx].astype(jnp.float32)
    return out


def _reference(h, ret_feat, batch, params, n_heads, fusion_type='xattn_cat'):
    """Pure numpy f32 reference mirroring the PyTorch forward."""
    h = np.asarray(h, np.float32)
    ret_feat = np.asarray(ret_feat, np.float32)
    batch_np = np.asarray(batch)
    p = {k: np.asarray(v, np.float32) for k, v in params.items()}
    D = h.shape[1]
    hd = D // n_heads
    B = int(batch_np.max()) + 1
    counts = np.bincount(batch_np, minlength=B)
    L = int(counts.max())
    offsets = np.concatenate([[0], np.cumsum(counts)[:-1]])
    row = np.arange(batch_np.shape[0]) - offsets[batch_np]
    h_dense = np.zeros((B, L, D), np.float32)
    h_dense[batch_np, row] = h

    kv_in = ret_feat @ p['w_lq'].T + p['b_lq']
    q = h_dense @ p['w_q'].T + p['b_q']
    k = kv_in @ p['w_k'].T + p['b_k']
    v = kv_in @ p['w_v'].T + p['b_v']
    S = k.shape[1]
    qh = q.reshape(B, L, n_heads, hd).transpose(0, 2, 1, 3)
    kh = k.reshape(B, S, n_heads, hd).transpose(0, 2, 1, 3)
    vh = v.reshape(B, S, n_heads, hd).transpose(0, 2, 1, 3)
    s = np.einsum('bhld,bhsd->bhls', qh, kh) / np.sqrt(hd)
    s = s - s.max(-1, keepdims=True)
    pr = np.exp(s)
    pr = pr / pr.sum(-1, keepdims=True)
    o = np.einsum('bhls,bhsd->bhld', pr, vh).transpose(0, 2, 1, 3).reshape(B, L, D)
    o = o @ p['w_o'].T + p['b_o']
    attn_valid = o[batch_np, row]                       # [N, D]
    if fusion_type == 'xattn_cat':
        cat = np.concatenate([h, attn_valid], axis=1)
        return cat @ p['w_cat'].T + p['b_cat']
    return attn_valid


if __name__ == "__main__":
    # small, deterministic problem
    h_dim = 32
    ret_feat_dim = 16
    n_heads = 4
    S = 8                                 # retrieval sequence length
    counts = [10, 14]                     # atoms per graph -> N_total = 24
    N_total = sum(counts)

    key = jax.random.PRNGKey(0)
    k_h, k_rf, k_params = jax.random.split(key, 3)

    h = jax.random.normal(k_h, (N_total, h_dim), jnp.float32)
    ret_feat = jax.random.normal(k_rf, (len(counts), S, ret_feat_dim), jnp.float32)
    batch = np.concatenate([np.full(c, i, np.int32) for i, c in enumerate(counts)])
    mask_ligand = np.ones((N_total,), np.bool_)    # unused by the forward (as in PyTorch)

    params = init_params(k_params, h_dim, ret_feat_dim)

    out = cross_attention_core(h, ret_feat, batch, params, n_heads,
                               fusion_type='xattn_cat', mask_ligand=mask_ligand)
    out = jax.block_until_ready(out)

    ref = _reference(h, ret_feat, batch, params, n_heads, fusion_type='xattn_cat')
    assert out.shape == (N_total, h_dim)
    out_np = np.asarray(out, np.float32)
    assert np.allclose(out_np, ref, atol=3e-2, rtol=3e-2), \
        f"max abs err {np.max(np.abs(out_np - ref))}"

    print("KERNEL_OK")
</pallas_src>

<mosaic_0001>
module attributes {stable_mosaic.version = 11 : i64} {
  func.func @kernel(%arg0: i32, %arg1: memref<2xi32, #tpu.memory_space<smem>>, %arg2: memref<32x32xbf16, #tpu.memory_space<vmem>>, %arg3: memref<16x16xbf16, #tpu.memory_space<vmem>>, %arg4: memref<32x32xbf16, #tpu.memory_space<vmem>>, %arg5: memref<32x32xbf16, #tpu.memory_space<vmem>>, %arg6: memref<1x32xf32, #tpu.memory_space<vmem>>, %arg7: memref<16x32xbf16, #tpu.memory_space<vmem>>, %arg8: memref<1x32xf32, #tpu.memory_space<vmem>>, %arg9: memref<16x32xbf16, #tpu.memory_space<vmem>>, %arg10: memref<1x32xf32, #tpu.memory_space<vmem>>, %arg11: memref<32x32xbf16, #tpu.memory_space<vmem>>, %arg12: memref<32x32xbf16, #tpu.memory_space<vmem>>, %arg13: memref<1x32xf32, #tpu.memory_space<vmem>>, %arg14: memref<32x32xbf16, #tpu.memory_space<vmem>>, %arg15: memref<32x32xbf16, #tpu.memory_space<vmem>>, %arg16: memref<16x32xbf16, #tpu.memory_space<vmem>>, %arg17: memref<16x32xbf16, #tpu.memory_space<vmem>>) attributes {dimension_semantics = [#tpu.dimension_semantics<parallel>], iteration_bounds = array<i64: 1>, scalar_prefetch = 1 : i64, scratch_operands = 3 : i64, tpu.core_type = #tpu.core_type<tc>, window_params = [{transform_indices = @transform_0, window_bounds = array<i64: 32, 32>}, {transform_indices = @transform_1, window_bounds = array<i64: 16, 16>}, {pipeline_mode = #tpu.pipeline_mode<synchronous>, transform_indices = @transform_2, window_bounds = array<i64: 32, 32>}, {pipeline_mode = #tpu.pipeline_mode<synchronous>, transform_indices = @transform_3, window_bounds = array<i64: 32, 32>}, {pipeline_mode = #tpu.pipeline_mode<synchronous>, transform_indices = @transform_4, window_bounds = array<i64: 1, 32>}, {pipeline_mode = #tpu.pipeline_mode<synchronous>, transform_indices = @transform_5, window_bounds = array<i64: 16, 32>}, {pipeline_mode = #tpu.pipeline_mode<synchronous>, transform_indices = @transform_6, window_bounds = array<i64: 1, 32>}, {pipeline_mode = #tpu.pipeline_mode<synchronous>, transform_indices = @transform_7, window_bounds = array<i64: 16, 32>}, {pipeline_mode = #tpu.pipeline_mode<synchronous>, transform_indices = @transform_8, window_bounds = array<i64: 1, 32>}, {pipeline_mode = #tpu.pipeline_mode<synchronous>, transform_indices = @transform_9, window_bounds = array<i64: 32, 32>}, {pipeline_mode = #tpu.pipeline_mode<synchronous>, transform_indices = @transform_10, window_bounds = array<i64: 32, 32>}, {pipeline_mode = #tpu.pipeline_mode<synchronous>, transform_indices = @transform_11, window_bounds = array<i64: 1, 32>}, {transform_indices = @transform_12, window_bounds = array<i64: 32, 32>}]} {
    %c0 = arith.constant 0 : index
    %c0_0 = arith.constant 0 : index
    %0 = vector.load %arg2[%c0, %c0_0] : memref<32x32xbf16, #tpu.memory_space<vmem>>, vector<32x32xbf16>
    %c0_1 = arith.constant 0 : index
    %c0_2 = arith.constant 0 : index
    %1 = vector.load %arg3[%c0_1, %c0_2] : memref<16x16xbf16, #tpu.memory_space<vmem>>, vector<16x16xbf16>
    %c0_3 = arith.constant 0 : index
    %c0_4 = arith.constant 0 : index
    %2 = vector.load %arg5[%c0_3, %c0_4] : memref<32x32xbf16, #tpu.memory_space<vmem>>, vector<32x32xbf16>
    %cst = arith.constant dense<0.000000e+00> : vector<32x32xf32>
    %3 = tpu.matmul %0, %2, %cst {dimension_numbers = #tpu.dot_dimension_numbers<[1], [0], [0], [1], [0, 0, 1, 1], [], []>} : vector<32x32xbf16>, vector<32x32xbf16>, vector<32x32xf32> -> vector<32x32xf32>
    %c0_5 = arith.constant 0 : index
    %c0_6 = arith.constant 0 : index
    %4 = vector.load %arg6[%c0_5, %c0_6] : memref<1x32xf32, #tpu.memory_space<vmem>>, vector<1x32xf32>
    %5 = vector.broadcast %4 : vector<1x32xf32> to vector<32x32xf32>
    %6 = arith.addf %3, %5 : vector<32x32xf32>
    %7 = arith.truncf %6 : vector<32x32xf32> to vector<32x32xbf16>
    %c0_7 = arith.constant 0 : index
    %c0_8 = arith.constant 0 : index
    %8 = vector.load %arg15[%c0_7, %c0_8] : memref<32x32xbf16, #tpu.memory_space<vmem>>, vector<32x32xbf16>
    tpu.vector_store %arg15[%c0_7, %c0_8], %7 {strides = array<i32>} : memref<32x32xbf16, #tpu.memory_space<vmem>>, vector<32x32xbf16>,
    %c0_9 = arith.constant 0 : index
    %c0_10 = arith.constant 0 : index
    %9 = vector.load %arg7[%c0_9, %c0_10] : memref<16x32xbf16, #tpu.memory_space<vmem>>, vector<16x32xbf16>
    %cst_11 = arith.constant dense<0.000000e+00> : vector<16x32xf32>
    %10 = tpu.matmul %1, %9, %cst_11 {dimension_numbers = #tpu.dot_dimension_numbers<[1], [0], [0], [1], [0, 0, 1, 1], [], []>} : vector<16x16xbf16>, vector<16x32xbf16>, vector<16x32xf32> -> vector<16x32xf32>
    %c0_12 = arith.constant 0 : index
    %c0_13 = arith.constant 0 : index
    %11 = vector.load %arg8[%c0_12, %c0_13] : memref<1x32xf32, #tpu.memory_space<vmem>>, vector<1x32xf32>
    %12 = vector.broadcast %11 : vector<1x32xf32> to vector<16x32xf32>
    %13 = arith.addf %10, %12 : vector<16x32xf32>
    %14 = arith.truncf %13 : vector<16x32xf32> to vector<16x32xbf16>
    %c0_14 = arith.constant 0 : index
    %c0_15 = arith.constant 0 : index
    %15 = vector.load %arg16[%c0_14, %c0_15] : memref<16x32xbf16, #tpu.memory_space<vmem>>, vector<16x32xbf16>
    tpu.vector_store %arg16[%c0_14, %c0_15], %14 {strides = array<i32>} : memref<16x32xbf16, #tpu.memory_space<vmem>>, vector<16x32xbf16>,
    %c0_16 = arith.constant 0 : index
    %c0_17 = arith.constant 0 : index
    %16 = vector.load %arg9[%c0_16, %c0_17] : memref<16x32xbf16, #tpu.memory_space<vmem>>, vector<16x32xbf16>
    %cst_18 = arith.constant dense<0.000000e+00> : vector<16x32xf32>
    %17 = tpu.matmul %1, %16, %cst_18 {dimension_numbers = #tpu.dot_dimension_numbers<[1], [0], [0], [1], [0, 0, 1, 1], [], []>} : vector<16x16xbf16>, vector<16x32xbf16>, vector<16x32xf32> -> vector<16x32xf32>
    %c0_19 = arith.constant 0 : index
    %c0_20 = arith.constant 0 : index
    %18 = vector.load %arg10[%c0_19, %c0_20] : memref<1x32xf32, #tpu.memory_space<vmem>>, vector<1x32xf32>
    %19 = vector.broadcast %18 : vector<1x32xf32> to vector<16x32xf32>
    %20 = arith.addf %17, %19 : vector<16x32xf32>
    %21 = arith.truncf %20 : vector<16x32xf32> to vector<16x32xbf16>
    %c0_21 = arith.constant 0 : index
    %c0_22 = arith.constant 0 : index
    %22 = vector.load %arg17[%c0_21, %c0_22] : memref<16x32xbf16, #tpu.memory_space<vmem>>, vector<16x32xbf16>
    tpu.vector_store %arg17[%c0_21, %c0_22], %21 {strides = array<i32>} : memref<16x32xbf16, #tpu.memory_space<vmem>>, vector<16x32xbf16>,
    %c0_23 = arith.constant 0 : index
    %c0_24 = arith.constant 0 : index
    %23 = vector.load %arg12[%c0_23, %c0_24] : memref<32x32xbf16, #tpu.memory_space<vmem>>, vector<32x32xbf16>
    %cst_25 = arith.constant dense<0.000000e+00> : vector<32x32xf32>
    %24 = tpu.matmul %0, %23, %cst_25 {dimension_numbers = #tpu.dot_dimension_numbers<[1], [0], [0], [1], [0, 0, 1, 1], [], []>} : vector<32x32xbf16>, vector<32x32xbf16>, vector<32x32xf32> -> vector<32x32xf32>
    %c0_26 = arith.constant 0 : index
    %c0_27 = arith.constant 0 : index
    %25 = vector.load %arg13[%c0_26, %c0_27] : memref<1x32xf32, #tpu.memory_space<vmem>>, vector<1x32xf32>
    %26 = vector.broadcast %25 : vector<1x32xf32> to vector<32x32xf32>
    %27 = arith.addf %24, %26 : vector<32x32xf32>
    %28 = arith.truncf %27 : vector<32x32xf32> to vector<32x32xbf16>
    %c0_28 = arith.constant 0 : index
    %c0_29 = arith.constant 0 : index
    %29 = vector.load %arg14[%c0_28, %c0_29] : memref<32x32xbf16, #tpu.memory_space<vmem>>, vector<32x32xbf16>
    tpu.vector_store %arg14[%c0_28, %c0_29], %28 {strides = array<i32>} : memref<32x32xbf16, #tpu.memory_space<vmem>>, vector<32x32xbf16>,
    %c0_i32 = arith.constant 0 : i32
    %c2_i32 = arith.constant 2 : i32
    %30 = arith.addi %c0_i32, %c2_i32 : i32
    %c1_i32 = arith.constant 1 : i32
    scf.for %arg18 = %c0_i32 to %30 step %c1_i32  : i32 {
      %c2_i32_31 = arith.constant 2 : i32
      %31 = arith.muli %arg0, %c2_i32_31 : i32
      %32 = arith.addi %31, %arg18 : i32
      %33 = arith.index_cast %32 : i32 to index
      %34 = memref.load %arg1[%33] : memref<2xi32, #tpu.memory_space<smem>>
      %c0_i32_32 = arith.constant 0 : i32
      %35 = arith.cmpi sgt, %34, %c0_i32_32 : i32
      %36 = arith.extui %35 : i1 to i32
      %c0_i32_33 = arith.constant 0 : i32
      %37 = arith.cmpi ne, %36, %c0_i32_33 : i32
      scf.if %37 {
        %c16_i32 = arith.constant 16 : i32
        %38 = arith.muli %arg18, %c16_i32 : i32
        %39 = tpu.assume_multiple %38, 16 : i32
        %c8_i32 = arith.constant 8 : i32
        %40 = arith.muli %arg18, %c8_i32 : i32
        %41 = tpu.assume_multiple %40, 8 : i32
        %42 = arith.index_cast %39 : i32 to index
        %c0_34 = arith.constant 0 : index
        %43 = vector.load %arg15[%42, %c0_34] : memref<32x32xbf16, #tpu.memory_space<vmem>>, vector<16x32xbf16>
        %44 = arith.index_cast %41 : i32 to index
        %c0_35 = arith.constant 0 : index
        %45 = vector.load %arg16[%44, %c0_35] : memref<16x32xbf16, #tpu.memory_space<vmem>>, vector<8x32xbf16>
        %46 = arith.index_cast %41 : i32 to index
        %c0_36 = arith.constant 0 : index
        %47 = vector.load %arg17[%46, %c0_36] : memref<16x32xbf16, #tpu.memory_space<vmem>>, vector<8x32xbf16>
        %c0_37 = arith.constant 0 : index
        %c0_38 = arith.constant 0 : index
        %48 = vector.load %arg4[%c0_37, %c0_38] : memref<32x32xbf16, #tpu.memory_space<vmem>>, vector<32x32xbf16>
        %49 = tpu.concatenate %45, %45, %45, %45 in 0 : vector<8x32xbf16>, vector<8x32xbf16>, vector<8x32xbf16>, vector<8x32xbf16> -> vector<32x32xbf16>
        %50 = arith.mulf %49, %48 : vector<32x32xbf16>
        %51 = tpu.concatenate %47, %47, %47, %47 in 0 : vector<8x32xbf16>, vector<8x32xbf16>, vector<8x32xbf16>, vector<8x32xbf16> -> vector<32x32xbf16>
        %52 = arith.mulf %51, %48 : vector<32x32xbf16>
        %cst_39 = arith.constant dense<0.000000e+00> : vector<16x32xf32>
        %53 = tpu.matmul %43, %50, %cst_39 {dimension_numbers = #tpu.dot_dimension_numbers<[1], [1], [0], [0], [0, 0, 1, 0], [], []>} : vector<16x32xbf16>, vector<32x32xbf16>, vector<16x32xf32> -> vector<16x32xf32>
        %cst_40 = arith.constant dense<0xFF800000> : vector<16xf32>
        %54 = vector.multi_reduction <maximumf>, %53, %cst_40 [1] : vector<16x32xf32> to vector<16xf32>
        %55 = vector.shape_cast %54 : vector<16xf32> to vector<16x1xf32>
        %56 = vector.broadcast %55 : vector<16x1xf32> to vector<16x32xf32>
        %57 = arith.subf %53, %56 : vector<16x32xf32>
        %58 = math.exp %57 : vector<16x32xf32>
        %59 = arith.truncf %58 : vector<16x32xf32> to vector<16x32xbf16>
        %cst_41 = arith.constant dense<0.000000e+00> : vector<16x32xf32>
        %60 = tpu.matmul %59, %52, %cst_41 {dimension_numbers = #tpu.dot_dimension_numbers<[1], [0], [0], [1], [0, 0, 1, 1], [], []>} : vector<16x32xbf16>, vector<32x32xbf16>, vector<16x32xf32> -> vector<16x32xf32>
        %cst_42 = arith.constant dense<0.000000e+00> : vector<16x32xf32>
        %61 = tpu.matmul %59, %48, %cst_42 {dimension_numbers = #tpu.dot_dimension_numbers<[1], [0], [0], [1], [0, 0, 1, 1], [], []>} : vector<16x32xbf16>, vector<32x32xbf16>, vector<16x32xf32> -> vector<16x32xf32>
        %cst_43 = arith.constant 1.000000e-30 : f32
        %62 = vector.broadcast %cst_43 : f32 to vector<16x32xf32>
        %63 = arith.maximumf %61, %62 : vector<16x32xf32>
        %64 = tpu.reciprocal %63 {approx = true} : vector<16x32xf32> -> vector<16x32xf32>
        %65 = arith.mulf %60, %64 : vector<16x32xf32>
        %66 = arith.truncf %65 : vector<16x32xf32> to vector<16x32xbf16>
        %c0_44 = arith.constant 0 : index
        %c0_45 = arith.constant 0 : index
        %67 = vector.load %arg11[%c0_44, %c0_45] : memref<32x32xbf16, #tpu.memory_space<vmem>>, vector<32x32xbf16>
        %cst_46 = arith.constant dense<0.000000e+00> : vector<16x32xf32>
        %68 = tpu.matmul %66, %67, %cst_46 {dimension_numbers = #tpu.dot_dimension_numbers<[1], [0], [0], [1], [0, 0, 1, 1], [], []>} : vector<16x32xbf16>, vector<32x32xbf16>, vector<16x32xf32> -> vector<16x32xf32>
        %69 = arith.index_cast %39 : i32 to index
        %c0_47 = arith.constant 0 : index
        %70 = vector.load %arg14[%69, %c0_47] : memref<32x32xbf16, #tpu.memory_space<vmem>>, vector<16x32xbf16>
        %71 = arith.extf %70 : vector<16x32xbf16> to vector<16x32xf32>
        %72 = arith.addf %71, %68 : vector<16x32xf32>
        %73 = arith.truncf %72 : vector<16x32xf32> to vector<16x32xbf16>
        %74 = arith.index_cast %39 : i32 to index
        %c0_48 = arith.constant 0 : index
        %75 = vector.load %arg14[%74, %c0_48] : memref<32x32xbf16, #tpu.memory_space<vmem>>, vector<16x32xbf16>
        tpu.vector_store %arg14[%74, %c0_48], %73 {strides = array<i32>} : memref<32x32xbf16, #tpu.memory_space<vmem>>, vector<16x32xbf16>,
      } else {
      }
    }
    %c2_i32_30 = arith.constant 2 : i32
    return
  }
  func.func @transform_0(%arg0: i32, %arg1: memref<2xi32, #tpu.memory_space<smem>>) -> (i32, i32) {
    %c0_i32 = arith.constant 0 : i32
    %c0_i32_0 = arith.constant 0 : i32
    return %arg0, %c0_i32 : i32, i32
  }
  func.func @transform_1(%arg0: i32, %arg1: memref<2xi32, #tpu.memory_space<smem>>) -> (i32, i32) {
    %c0_i32 = arith.constant 0 : i32
    %c0_i32_0 = arith.constant 0 : i32
    return %arg0, %c0_i32 : i32, i32
  }
  func.func @transform_2(%arg0: i32, %arg1: memref<2xi32, #tpu.memory_space<smem>>) -> (i32, i32) {
    %c0_i32 = arith.constant 0 : i32
    %c0_i32_0 = arith.constant 0 : i32
    %c0_i32_1 = arith.constant 0 : i32
    return %c0_i32, %c0_i32_0 : i32, i32
  }
  func.func @transform_3(%arg0: i32, %arg1: memref<2xi32, #tpu.memory_space<smem>>) -> (i32, i32) {
    %c0_i32 = arith.constant 0 : i32
    %c0_i32_0 = arith.constant 0 : i32
    %c0_i32_1 = arith.constant 0 : i32
    return %c0_i32, %c0_i32_0 : i32, i32
  }
  func.func @transform_4(%arg0: i32, %arg1: memref<2xi32, #tpu.memory_space<smem>>) -> (i32, i32) {
    %c0_i32 = arith.constant 0 : i32
    %c0_i32_0 = arith.constant 0 : i32
    %c0_i32_1 = arith.constant 0 : i32
    return %c0_i32, %c0_i32_0 : i32, i32
  }
  func.func @transform_5(%arg0: i32, %arg1: memref<2xi32, #tpu.memory_space<smem>>) -> (i32, i32) {
    %c0_i32 = arith.constant 0 : i32
    %c0_i32_0 = arith.constant 0 : i32
    %c0_i32_1 = arith.constant 0 : i32
    return %c0_i32, %c0_i32_0 : i32, i32
  }
  func.func @transform_6(%arg0: i32, %arg1: memref<2xi32, #tpu.memory_space<smem>>) -> (i32, i32) {
    %c0_i32 = arith.constant 0 : i32
    %c0_i32_0 = arith.constant 0 : i32
    %c0_i32_1 = arith.constant 0 : i32
    return %c0_i32, %c0_i32_0 : i32, i32
  }
  func.func @transform_7(%arg0: i32, %arg1: memref<2xi32, #tpu.memory_space<smem>>) -> (i32, i32) {
    %c0_i32 = arith.constant 0 : i32
    %c0_i32_0 = arith.constant 0 : i32
    %c0_i32_1 = arith.constant 0 : i32
    return %c0_i32, %c0_i32_0 : i32, i32
  }
  func.func @transform_8(%arg0: i32, %arg1: memref<2xi32, #tpu.memory_space<smem>>) -> (i32, i32) {
    %c0_i32 = arith.constant 0 : i32
    %c0_i32_0 = arith.constant 0 : i32
    %c0_i32_1 = arith.constant 0 : i32
    return %c0_i32, %c0_i32_0 : i32, i32
  }
  func.func @transform_9(%arg0: i32, %arg1: memref<2xi32, #tpu.memory_space<smem>>) -> (i32, i32) {
    %c0_i32 = arith.constant 0 : i32
    %c0_i32_0 = arith.constant 0 : i32
    %c0_i32_1 = arith.constant 0 : i32
    return %c0_i32, %c0_i32_0 : i32, i32
  }
  func.func @transform_10(%arg0: i32, %arg1: memref<2xi32, #tpu.memory_space<smem>>) -> (i32, i32) {
    %c0_i32 = arith.constant 0 : i32
    %c0_i32_0 = arith.constant 0 : i32
    %c0_i32_1 = arith.constant 0 : i32
    return %c0_i32, %c0_i32_0 : i32, i32
  }
  func.func @transform_11(%arg0: i32, %arg1: memref<2xi32, #tpu.memory_space<smem>>) -> (i32, i32) {
    %c0_i32 = arith.constant 0 : i32
    %c0_i32_0 = arith.constant 0 : i32
    %c0_i32_1 = arith.constant 0 : i32
    return %c0_i32, %c0_i32_0 : i32, i32
  }
  func.func @transform_12(%arg0: i32, %arg1: memref<2xi32, #tpu.memory_space<smem>>) -> (i32, i32) {
    %c0_i32 = arith.constant 0 : i32
    %c0_i32_0 = arith.constant 0 : i32
    return %arg0, %c0_i32 : i32, i32
  }
}

</mosaic_0001>

<bundles_post_ra>
// kernel: tpu_custom_call.1
= control target key start
LH: loop header
LB: loop body
LE: loop exit
PB: predicated region body
PF: predicated region fallthrough
CT: control target
= control target key end

     0   :  { %s1251_s25 = smov [#allocation6]   ;;  %s1479_s0 = inlined_call_operand.hbm [shape: s32[2], index: 0, kind: input, shape index: {}]   ;;  %s1480_s1 = inlined_call_operand.hbm [shape: bf16[32,32], index: 1, kind: input, shape index: {}]   ;;  %s1481_s2 = inlined_call_operand.hbm [shape: bf16[16,16], index: 2, kind: input, shape index: {}]   ;;  %s1482_s3 = inlined_call_operand.hbm [shape: bf16[32,32], index: 3, kind: input, shape index: {}]   ;;  %s1483_s4 = inlined_call_operand.hbm [shape: bf16[32,32], index: 4, kind: input, shape index: {}]   ;;  %s1484_s5 = inlined_call_operand.vmem [shape: f32[1,32], index: 5, kind: input, shape index: {}]   ;;  %s1485_s6 = inlined_call_operand.hbm [shape: bf16[16,32], index: 6, kind: input, shape index: {}]   ;;  %s1486_s7 = inlined_call_operand.vmem [shape: f32[1,32], index: 7, kind: input, shape index: {}]   ;;  %s1487_s8 = inlined_call_operand.hbm [shape: bf16[16,32], index: 8, kind: input, shape index: {}]   ;;  %s1488_s9 = inlined_call_operand.hbm [shape: f32[1,32], index: 9, kind: input, shape index: {}]   ;;  %s1489_s10 = inlined_call_operand.vmem [shape: bf16[32,32], index: 10, kind: input, shape index: {}]   ;;  %s1490_s11 = inlined_call_operand.hbm [shape: bf16[32,32], index: 11, kind: input, shape index: {}]   ;;  %s1491_s12 = inlined_call_operand.vmem [shape: f32[1,32], index: 12, kind: input, shape index: {}]   ;;  %s1492_s13 = inlined_call_operand.hbm [shape: bf16[32,32], index: 13, kind: output, shape index: {}]  }
   0x1   :  { %19 = dma.hbm_to_smem %s1479_s0, 16, %s1251_s25, [#allocation5] }
   0x2   :  { %1233 = dma.done.wait [#allocation5], 16 }
   0x3   :  { %1234 = vsyncadd [#allocation5], 4294967280 }
   0x4   :  { %21 = sfence }
   0x5   :  { %22 = vsyncpa [#allocation8], 0 }
   0x6   :  { %23 = vsyncpa [#allocation11], 0 }
   0x7   :  { %24 = vsyncpa [#allocation14], 0 }
   0x8   :  { %25 = vsyncpa [#allocation17], 0 }
   0x9   :  { %26 = vsyncpa [#allocation20], 0 }
   0xa   :  { %27 = vsyncpa [#allocation9], 0  ;;  %s1252_s28 = smov [#allocation10]   ;;  %s1253_s30 = smov [#allocation13]  }
   0xb   :  { %s45_s29 = sshll.u32 %s1252_s28, 4  ;;  %s69_s14 = sshll.u32 %s1253_s30, 4  ;;  %s46_s29 = int_to_ptr.vmem [resolvable:$true] %s45_s29  ;;  %s70_s14 = int_to_ptr.vmem [resolvable:$true] %s69_s14 }
   0xc   :  { %s1057_s15 = scalar_lea.vmem %s46_s29, 128  ;;  %p1062_p1 = scmp.lt.s32.totalorder %s46_s29, %s46_s29 }
   0xd   :  { %p1058_p0 = scmp.ne.s32.totalorder %s46_s29, %s1057_s15  ;;  %p1063_p2 = scmp.lt.s32.totalorder %s1057_s15, %s1057_s15 }
   0xf   :  { %p1064_p3 = por %p1063_p2, %p1062_p1 }
  0x11   :  { %p1065_p4 = pnand %p1064_p3, %p1058_p0 }
  0x13   :  { %1068 = shalt.err (!%p1065_p4)
}
  0x14   :  { %s1254_s0 = smov 64   ;;  %s1255_s16 = smov 4  }
  0x15   :  { %51 = dma.hbm_to_vmem [thread:$0]  %s1481_s2, 128, %s46_s29, [#allocation11], %s1254_s0, %s1254_s0, %s1255_s16  }
  0x16   :  { %s1077_s19 = scalar_lea.vmem %s70_s14, 256  ;;  %p1082_p6 = scmp.lt.s32.totalorder %s70_s14, %s70_s14 }
  0x17   :  { %p1078_p5 = scmp.ne.s32.totalorder %s70_s14, %s1077_s19  ;;  %p1083_p7 = scmp.lt.s32.totalorder %s1077_s19, %s1077_s19 }
  0x19   :  { %p1084_p8 = por %p1083_p7, %p1082_p6 }
  0x1b   :  { %p1085_p9 = pnand %p1084_p8, %p1078_p5 }
  0x1d   :  { %1088 = shalt.err (!%p1085_p9)
}
  0x1e   :  { %75 = dma.hbm_to_vmem [thread:$0]  %s1483_s4, 256, %s70_s14, [#allocation14], %s1254_s0, %s1254_s0, %s1255_s16  }
  0x1f   :  { %s1256_s22 = smov [#allocation16]   ;;  %s1257_s24 = smov [#allocation7]  }
  0x20   :  { %s97_s23 = sshll.u32 %s1256_s22, 4  ;;  %s33_s25 = sshll.u32 %s1257_s24, 4  ;;  %s98_s23 = int_to_ptr.vmem [resolvable:$true] %s97_s23  ;;  %s34_s25 = int_to_ptr.vmem [resolvable:$true] %s33_s25 }
  0x21   :  { %s1097_s2 = scalar_lea.vmem %s98_s23, 128  ;;  %p1102_p11 = scmp.lt.s32.totalorder %s98_s23, %s98_s23 }
  0x22   :  { %p1098_p10 = scmp.ne.s32.totalorder %s98_s23, %s1097_s2  ;;  %p1103_p12 = scmp.lt.s32.totalorder %s1097_s2, %s1097_s2 }
  0x24   :  { %p1104_p13 = por %p1103_p12, %p1102_p11 }
  0x26   :  { %p1105_p0 = pnand %p1104_p13, %p1098_p10 }
  0x28   :  { %1108 = shalt.err (!%p1105_p0)
}
  0x29   :  { %103 = dma.hbm_to_vmem [thread:$0]  %s1487_s8, 128, %s98_s23, [#allocation17], %s1254_s0, %s1254_s0, %s1255_s16  }
  0x2a   :  { %s1117_s4 = scalar_lea.vmem %s34_s25, 256  ;;  %p1122_p2 = scmp.lt.s32.totalorder %s34_s25, %s34_s25 }
  0x2b   :  { %p1118_p1 = scmp.ne.s32.totalorder %s34_s25, %s1117_s4  ;;  %p1123_p3 = scmp.lt.s32.totalorder %s1117_s4, %s1117_s4 }
  0x2d   :  { %p1124_p4 = por %p1123_p3, %p1122_p2 }
  0x2f   :  { %p1125_p5 = pnand %p1124_p4, %p1118_p1 }
  0x31   :  { %1128 = shalt.err (!%p1125_p5)
}
  0x32   :  { %39 = dma.hbm_to_vmem [thread:$0]  %s1480_s1, 256, %s34_s25, [#allocation8], %s1254_s0, %s1254_s0, %s1255_s16  }
  0x33   :  { %s1258_s30 = smov [#allocation12]   ;;  %s1259_s15 = smov [#allocation15]  }
  0x34   :  { %s57_s14 = sshll.u32 %s1258_s30, 4  ;;  %s83_s17 = sshll.u32 %s1259_s15, 4  ;;  %s58_s14 = int_to_ptr.vmem [resolvable:$true] %s57_s14  ;;  %s84_s17 = int_to_ptr.vmem [resolvable:$true] %s83_s17 }
  0x35   :  { %s1137_s8 = scalar_lea.vmem %s58_s14, 256  ;;  %p1142_p7 = scmp.lt.s32.totalorder %s58_s14, %s58_s14 }
  0x36   :  { %p1138_p6 = scmp.ne.s32.totalorder %s58_s14, %s1137_s8  ;;  %p1143_p8 = scmp.lt.s32.totalorder %s1137_s8, %s1137_s8 }
  0x38   :  { %p1144_p9 = por %p1143_p8, %p1142_p7 }
  0x3a   :  { %p1145_p10 = pnand %p1144_p9, %p1138_p6 }
  0x3c   :  { %1148 = shalt.err (!%p1145_p10)
}
  0x3d   :  { %63 = dma.hbm_to_vmem [thread:$0]  %s1482_s3, 256, %s58_s14, [#allocation11], %s1254_s0, %s1254_s0, %s1255_s16  }
  0x3e   :  { %s1157_s1 = scalar_lea.vmem %s84_s17, 128  ;;  %p1162_p12 = scmp.lt.s32.totalorder %s84_s17, %s84_s17 }
  0x3f   :  { %p1158_p11 = scmp.ne.s32.totalorder %s84_s17, %s1157_s1  ;;  %p1163_p13 = scmp.lt.s32.totalorder %s1157_s1, %s1157_s1 }
  0x41   :  { %p1164_p0 = por %p1163_p13, %p1162_p12 }
  0x43   :  { %p1165_p1 = pnand %p1164_p0, %p1158_p11 }
  0x45   :  { %1168 = shalt.err (!%p1165_p1)
}
  0x46   :  { %89 = dma.hbm_to_vmem [thread:$0]  %s1485_s6, 128, %s84_s17, [#allocation14], %s1254_s0, %s1254_s0, %s1255_s16  }
  0x47   :  { %s1260_s22 = smov [#allocation18]   ;;  %s1261_s24 = smov [#allocation19]  }
  0x48   :  { %s110_s23 = sshll.u32 %s1260_s22, 4  ;;  %s121_s25 = sshll.u32 %s1261_s24, 4  ;;  %s111_s23 = int_to_ptr.vmem [resolvable:$true] %s110_s23  ;;  %s122_s25 = int_to_ptr.vmem [resolvable:$true] %s121_s25 }
  0x49   :  { %s1177_s3 = scalar_lea.vmem %s111_s23, 16  ;;  %s1181_s2 = scalar_lea.vmem %s111_s23, 32 }
  0x4a   :  { %p1178_p2 = scmp.ne.s32.totalorder %s111_s23, %s1177_s3  ;;  %p1182_p3 = scmp.lt.s32.totalorder %s111_s23, %s111_s23 }
  0x4b   :  { %p1183_p4 = scmp.lt.s32.totalorder %s1181_s2, %s1177_s3 }
  0x4d   :  { %p1184_p5 = por %p1183_p4, %p1182_p3 }
  0x4f   :  { %p1185_p6 = pnand %p1184_p5, %p1178_p2 }
  0x51   :  { %1188 = shalt.err (!%p1185_p6)
}
  0x52   :  { %113 = dma.hbm_to_vmem [thread:$0]  %s1488_s9, 16, %s111_s23, [#allocation17]  }
  0x53   :  { %s1197_s4 = scalar_lea.vmem %s122_s25, 256  ;;  %p1202_p8 = scmp.lt.s32.totalorder %s122_s25, %s122_s25 }
  0x54   :  { %p1198_p7 = scmp.ne.s32.totalorder %s122_s25, %s1197_s4  ;;  %p1203_p9 = scmp.lt.s32.totalorder %s1197_s4, %s1197_s4 }
  0x56   :  { %p1204_p10 = por %p1203_p9, %p1202_p8 }
  0x58   :  { %p1205_p11 = pnand %p1204_p10, %p1198_p7 }
  0x5a   :  { %1208 = shalt.err (!%p1205_p11)
}
  0x5b   :  { %127 = dma.hbm_to_vmem [thread:$0]  %s1490_s11, 256, %s122_s25, [#allocation20], %s1254_s0, %s1254_s0, %s1255_s16  }
  0x5c   :  { %1235 = dma.done.wait [#allocation8], 256  }
  0x5d   :  { %1236 = vsyncadd [#allocation8], 4294967040 }
  0x5e   :  { %1237 = dma.done.wait [#allocation11], 384  }
  0x5f   :  { %1238 = vsyncadd [#allocation11], 4294966912 }
  0x60   :  { %1239 = dma.done.wait [#allocation14], 384  }
  0x61   :  { %1240 = vsyncadd [#allocation14], 4294966912 }
  0x62   :  { %1241 = dma.done.wait [#allocation17], 144  }
  0x63   :  { %1242 = vsyncadd [#allocation17], 4294967152 }
  0x64   :  { %1243 = dma.done.wait [#allocation20], 256  }
  0x65   :  { %1244 = vsyncadd [#allocation20], 4294967040  ;;  %v1262_v0 = vmov 0.0   ;;  %vm1263_vm0 = vmmov 0   ;;  %v1017_v1 = vld [vmem:[#allocation13 + $0x8] sm:$0xff]   ;;  %v1018_v2 = vld [vmem:[#allocation15] sm:$0xff]  }
  0x66   :  { %941 = vmatprep.subr.bf16.mxu1 %v1262_v0  ;;  %943 = vmatprep.mubr.msk.bf16.mxu1 %vm1263_vm0, %v1262_v0  ;;  %v1019_v3 = vld [vmem:[#allocation13] sm:$0xff]   ;;  %vm291_vm1 = vcmask 130048   ;;  %v1020_v4 = vld [vmem:[#allocation10] sm:$0xff]   ;;  %vm194_vm2 = vcmask 261120   ;;  %v1021_v5 = vld [vmem:[#allocation7] sm:$0xff]   ;;  %vm266_vm3 = vcmask 257024  }
  0x67   :  { %933 = vmatprep.subr.bf16.mxu0 %v1017_v1  ;;  %942 = vmatpush3.bf16.msra.mxu1 %v1018_v2  ;;  %v1022_v6 = vld [vmem:[#allocation7 + $0x8] sm:$0xff]   ;;  %v1023_v7 = vld [vmem:[#allocation19 + $0x8] sm:$0xff]   ;;  %v1024_v8 = vld [vmem:[#allocation16] sm:$0xff]  }
  0x68   :  { %934 = vmatpush3.bf16.msra.mxu0 %v1017_v1  ;;  %947 = vmatprep.subr.bf16.mxu1 %v1262_v0  ;;  %v1025_v9 = vld [vmem:[#allocation19] sm:$0xff]   ;;  %v857_v22 = vld [vmem:[#allocation18] ss:$0 sm:$0xff] }
  0x69   :  { %935 = vmatprep.subr.bf16.mxu0 %v1019_v3  ;;  %937 = vmatprep.mubr.msk.bf16.mxu0 %vm194_vm2, %v1021_v5  ;;  %v851_v10 = vld [vmem:[%s1486_s7] ss:$0 sm:$0xff] }
  0x6a   :  { %944 = vmatmul.mubr.msk.bf16.vlgmr.msra.gmra.mxu1 %vm291_vm1, %v1020_v4  ;;  %v840_v14 = vld [vmem:[%s1484_s5] ss:$0 sm:$0xff] }
  0x6b   :  { %949 = vmatprep.mubr.msk.bf16.mxu1 %vm1263_vm0, %v1262_v0  ;;  %948 = vmatpush3.bf16.msra.mxu1 %v1024_v8  ;;  %v862_v33 = vld [vmem:[%s1491_s12] ss:$0 sm:$0xff]  ;;  %s1414_s12 = smov 0  }
  0x6c   :  { %936 = vmatpush3.bf16.msra.mxu0 %v1019_v3 }
  0x6d   :  { %953 = vmatprep.subr.bf16.mxu0 %v1023_v7 }
  0x6f   :  { %938 = vmatmul.mubr.msk.bf16.vlgmr.msra.gmra.mxu0 %vm194_vm2, %v1022_v6 }
  0x70   :  { %954 = vmatpush3.bf16.msra.mxu0 %v1023_v7  ;;  %957 = vmatprep.mubr.msk.bf16.mxu0 %vm194_vm2, %v1021_v5 }
  0x71   :  { %955 = vmatprep.subr.bf16.mxu0 %v1025_v9 }
  0x72   :  { %950 = vmatmul.mubr.msk.bf16.vlgmr.msra.gmra.mxu1 %vm291_vm1, %v1020_v4 }
  0x74   :  { %956 = vmatpush3.bf16.msra.mxu0 %v1025_v9 }
  0x77   :  { %958 = vmatmul.mubr.msk.bf16.vlgmr.msra.gmra.mxu0 %vm194_vm2, %v1022_v6 }
 0x12a   :  { %v329_v11 = vpop.f32.mrf.mxu1 }
 0x12b   :  { %v330_v12 = vadd.f32 %v851_v10, %v329_v11 }
 0x12c   :  { %v945_v13 = vpop.f32.mrf.mxu1 }
 0x12d   :  { %v895_v15 = vpack.c.bf16 %v330_v12, %v330_v12 }
 0x12e   :  { %v332_v17 = vpop.f32.mrf.mxu1 }
 0x12f   :  { %v939_v16 = vpop.f32.mrf.mxu0  ;;  %344 = vst.msk [vmem:[#allocation3] sm:$0xf] %vm266_vm3, %v895_v15  ;;  %v333_v19 = vadd.f32 %v851_v10, %v332_v17 }
 0x130   :  { %v244_v18 = vadd.f32 %v939_v16, %v840_v14  ;;  %v946_v21 = vpop.f32.mrf.mxu1 }
 0x131   :  { %v235_v20 = vpop.f32.mrf.mxu0  ;;  %v896_v24 = vpack.c.bf16 %v333_v19, %v333_v19 }
 0x132   :  { %v893_v23 = vpack.c.bf16 %v244_v18, %v244_v18  ;;  %v236_v25 = vadd.f32 %v840_v14, %v235_v20  ;;  %v395_v27 = vpop.f32.mrf.mxu1 }
 0x133   :  { %v940_v26 = vpop.f32.mrf.mxu0  ;;  %345 = vst.msk [vmem:[#allocation3 + $0x4] sm:$0xf] %vm266_vm3, %v896_v24  ;;  %v396_v30 = vadd.f32 %v857_v22, %v395_v27 }
 0x134   :  { %269 = vst.msk [vmem:[#allocation2 + $0x8] sm:$0xf] %vm266_vm3, %v893_v23  ;;  %v891_v28 = vpack.c.bf16 %v236_v25, %v236_v25  ;;  %v247_v29 = vadd.f32 %v940_v26, %v840_v14  ;;  %v951_v32 = vpop.f32.mrf.mxu1 }
 0x135   :  { %v238_v31 = vpop.f32.mrf.mxu0  ;;  %v897_v35 = vpack.c.bf16 %v396_v30, %v396_v30 }
 0x136   :  { %267 = vst.msk [vmem:[#allocation2] sm:$0xf] %vm266_vm3, %v891_v28  ;;  %v894_v34 = vpack.c.bf16 %v247_v29, %v247_v29  ;;  %v239_v36 = vadd.f32 %v840_v14, %v238_v31  ;;  %v398_v38 = vpop.f32.mrf.mxu1 }
 0x137   :  { %v959_v37 = vpop.f32.mrf.mxu0  ;;  %410 = vst.msk [vmem:[#allocation4] sm:$0xf] %vm266_vm3, %v897_v35  ;;  %v399_v41 = vadd.f32 %v857_v22, %v398_v38 }
 0x138   :  { %270 = vst.msk [vmem:[#allocation2 + $0xc] sm:$0xf] %vm266_vm3, %v894_v34  ;;  %v892_v39 = vpack.c.bf16 %v239_v36, %v239_v36  ;;  %v478_v40 = vadd.f32 %v959_v37, %v862_v33  ;;  %v952_v43 = vpop.f32.mrf.mxu1 }
 0x139   :  { %v469_v42 = vpop.f32.mrf.mxu0  ;;  %v898_v45 = vpack.c.bf16 %v399_v41, %v399_v41 }
 0x13a   :  { %268 = vst.msk [vmem:[#allocation2 + $0x4] sm:$0xf] %vm266_vm3, %v892_v39  ;;  %v901_v44 = vpack.c.bf16 %v478_v40, %v478_v40  ;;  %v470_v46 = vadd.f32 %v862_v33, %v469_v42 }
 0x13b   :  { %v960_v47 = vpop.f32.mrf.mxu0  ;;  %411 = vst.msk [vmem:[#allocation4 + $0x4] sm:$0xf] %vm266_vm3, %v898_v45 }
 0x13c   :  { %502 = vst.msk [vmem:[#allocation21 + $0x8] sm:$0xf] %vm266_vm3, %v901_v44  ;;  %v899_v48 = vpack.c.bf16 %v470_v46, %v470_v46  ;;  %v481_v49 = vadd.f32 %v960_v47, %v862_v33 }
 0x13d   :  { %v472_v50 = vpop.f32.mrf.mxu0 }
 0x13e   :  { %500 = vst.msk [vmem:[#allocation21] sm:$0xf] %vm266_vm3, %v899_v48  ;;  %v902_v51 = vpack.c.bf16 %v481_v49, %v481_v49  ;;  %v473_v52 = vadd.f32 %v862_v33, %v472_v50 }
 0x140   :  { %503 = vst.msk [vmem:[#allocation21 + $0xc] sm:$0xf] %vm266_vm3, %v902_v51  ;;  %v900_v53 = vpack.c.bf16 %v473_v52, %v473_v52 }
 0x142   :  { %501 = vst.msk [vmem:[#allocation21 + $0x4] sm:$0xf] %vm266_vm3, %v900_v53 }
 0x143 LB: > { %s512_s14 = sld [smem:[#allocation6 + %s1249_s12]]  ;;  %s1249_s12 = sphi %s1414_s12, %s509_s12  }
 0x149   : > { %p871_p12 = scmp.le.s32.totalorder %s512_s14, 0 }
 0x14a   : > { %s873_s15 = sshll.u32 (!%p871_p12), %s1249_s12, 3  ;;  %s872_s18 = sshll.u32 (!%p871_p12), %s1249_s12, 4 }
 0x14b   : > { %516 = sbr.rel (%p871_p12) target bundleno = 1141 (0x475), region = 92  ;;  %s1422_s17 = sshra.s32 (!%p871_p12), %s873_s15, 3 }
 0x14c   : > { %s875_s8 = sshll.u32 (!%p871_p12), %s1422_s17, 2  ;;  %s1429_s19 = sshra.s32 (!%p871_p12), %s872_s18, 3 }
 0x14d   : > { %s528_s1 = scalar_lea.vmem (!%p871_p12), [#allocation3], %s875_s8  ;;  %s874_s20 = sshll.u32 (!%p871_p12), %s1429_s19, 2 }
 0x14e   : > { %s522_s21 = scalar_lea.vmem (!%p871_p12), [#allocation2], %s874_s20  ;;  %s531_s22 = scalar_lea.vmem (!%p871_p12), [#allocation4], %s875_s8 }
 0x14f   : > { %s789_s2 = scalar_lea.vmem (!%p871_p12), [#allocation21], %s874_s20 }
 0x150   : > { %v1264_v54 = vmov 0.0   ;;  %vm540_vm4 = vcmask 1043456   ;;  %vm1265_vm5 = vmmov 0   ;;  %v529_v55 = vld [vmem:[%s528_s1] sm:$0xf]  ;;  %v1027_v56 = vld [vmem:[#allocation12 + $0x8] sm:$0xff]  }
 0x151   : > { %961 = vmatprep.subr.bf16.mxu0 %v1264_v54  ;;  %969 = vmatprep.subr.bf16.mxu1 %v1264_v54  ;;  %v877_v57 = vcombine.low %v529_v55, %v529_v55  ;;  %v1028_v60 = vld [vmem:[#allocation12] sm:$0xff]   ;;  %v1029_v0 = vld [vmem:[%s522_s21] sm:$0xff]  }
 0x152   : > { %965 = vmatprep.mubr.msk.bf16.mxu0 %vm1265_vm5, %v1264_v54  ;;  %973 = vmatprep.mubr.msk.bf16.mxu1 %vm1265_vm5, %v1264_v54  ;;  %v532_v7 = vld [vmem:[%s531_s22] sm:$0xf]  ;;  %v1031_v21 = vld [vmem:[%s1489_s10 + $0x8] sm:$0xff]  }
 0x153   : > { %v543_v58 = vsel %vm540_vm4, %v529_v55, %v877_v57  ;;  %v880_v8 = vcombine.low %v532_v7, %v532_v7  ;;  %v1032_v22 = vld [vmem:[%s1489_s10] sm:$0xff]  }
 0x154   : > { %v558_v59 = vmul.bf16 %v1027_v56, %v543_v58  ;;  %v557_v62 = vmul.bf16 %v1028_v60, %v543_v58  ;;  %v906_v38 = vld [vmem:[%s789_s2] sm:$0xff]  }
 0x155   : > { %v564_v9 = vsel %vm540_vm4, %v532_v7, %v880_v8  ;;  %v907_v39 = vunpack.c.l.bf16 %v906_v38  ;;  %v908_v42 = vunpack.c.h.bf16 %v906_v38 }
 0x156   : > { %v580_v61 = vsel %vm194_vm2, %v558_v59, 0  ;;  %v577_v63 = vsel %vm194_vm2, %v557_v62, 0  ;;  %v567_v10 = vmul.bf16 %v1027_v56, %v564_v9  ;;  %v566_v11 = vmul.bf16 %v1028_v60, %v564_v9 }
 0x157   : > { %962 = vmatpush3.bf16.xpose.msra.mxu0 %v580_v61 }
 0x158   : > { %963 = vmatprep.subr.bf16.mxu0 %v1264_v54  ;;  %970 = vmatpush3.bf16.msra.mxu1 %v567_v10 }
 0x159   : > { %971 = vmatprep.subr.bf16.mxu1 %v1264_v54 }
 0x15c   : > { %972 = vmatpush3.bf16.msra.mxu1 %v566_v11 }
 0x15d   : > { %977 = vmatprep.subr.bf16.mxu1 %v1264_v54 }
 0x15f   : > { %964 = vmatpush3.bf16.xpose.msra.mxu0 %v577_v63 }
 0x160   : > { %985 = vmatprep.subr.bf16.mxu0 %v1264_v54 }
 0x166   : > { %966 = vmatmul.mubr.msk.bf16.vlgmr.msra.gmra.mxu0 %vm194_vm2, %v1029_v0 }
 0x167   : > { %989 = vmatprep.mubr.msk.bf16.mxu0 %vm1265_vm5, %v1264_v54  ;;  %986 = vmatpush3.bf16.msra.mxu0 %v1031_v21 }
 0x168   : > { %987 = vmatprep.subr.bf16.mxu0 %v1264_v54 }
 0x16b   : > { %988 = vmatpush3.bf16.msra.mxu0 %v1032_v22 }
 0x226   : > { %v616_v1 = vpop.f32.mrf.mxu0 }
 0x227   : > { %v623_v2 = vsel %vm194_vm2, %v616_v1, -inf }
 0x228   : > { %624 = vmax.xlane.f32.xlu0 %v623_v2  ;;  %v967_v3 = vpop.f32.mrf.mxu0 }
 0x22a   : > { %v619_v4 = vpop.f32.mrf.mxu0 }
 0x22b   : > { %v626_v5 = vsel %vm194_vm2, %v619_v4, -inf }
 0x22c   : > { %627 = vmax.xlane.f32.xlu0 %v626_v5  ;;  %v968_v6 = vpop.f32.mrf.mxu0 }
 0x2b1   : > { %v625_v12 = vpop.xlane.xlu0 %624 }
 0x2b2   : > { %v629_v13 = vsub.f32 %v616_v1, %v625_v12 }
 0x2b4   : > { %v631_v14 = vmul.f32 1.442695, %v629_v13 }
 0x2b5   : > { %v628_v15 = vpop.xlane.xlu0 %627 }
 0x2b6   : > { %v630_v16 = vsub.f32 %v619_v4, %v628_v15  ;;  %1033 = vpow2.f32 %v631_v14 }
 0x2b8   : > { %v633_v17 = vmul.f32 1.442695, %v630_v16 }
 0x2ba   : > { %1035 = vpow2.f32 %v633_v17 }
 0x2c3   : > { %v1034_v18 = vpop.eup %1033 }
 0x2c7   : > { %v1036_v19 = vpop.eup %1035 }
 0x2c8   : > { %v635_v20 = vpack.c.bf16 %v1036_v19, %v1034_v18 }
 0x2ca   : > { %974 = vmatmul.mubr.msk.bf16.vlgmr.msra.gmra.mxu1 %vm194_vm2, %v635_v20 }
 0x2cb   : > { %978 = vmatpush3.bf16.msra.mxu1 %v1027_v56  ;;  %981 = vmatprep.mubr.msk.bf16.mxu1 %vm1265_vm5, %v1264_v54 }
 0x2cc   : > { %979 = vmatprep.subr.bf16.mxu1 %v1264_v54 }
 0x2cf   : > { %980 = vmatpush3.bf16.msra.mxu1 %v1028_v60 }
 0x2d2   : > { %982 = vmatmul.mubr.msk.bf16.vlgmr.msra.gmra.mxu1 %vm194_vm2, %v635_v20 }
 0x38a   : > { %v673_v23 = vpop.f32.mrf.mxu1 }
 0x38c   : > { %v975_v24 = vpop.f32.mrf.mxu1 }
 0x38e   : > { %v676_v25 = vpop.f32.mrf.mxu1 }
 0x390   : > { %v976_v26 = vpop.f32.mrf.mxu1 }
 0x392   : > { %v714_v27 = vpop.f32.mrf.mxu1 }
 0x393   : > { %v721_v28 = vmax.f32 %v714_v27, 1e-30 }
 0x394   : > { %v983_v29 = vpop.f32.mrf.mxu1 }
 0x395   : > { %1037 = vrcp.f32 %v721_v28 }
 0x396   : > { %v717_v30 = vpop.f32.mrf.mxu1 }
 0x397   : > { %v722_v31 = vmax.f32 %v717_v30, 1e-30 }
 0x398   : > { %v984_v32 = vpop.f32.mrf.mxu1 }
 0x399   : > { %1039 = vrcp.f32 %v722_v31 }
 0x3a2   : > { %v1038_v33 = vpop.eup %1037 }
 0x3a3   : > { %v725_v35 = vmul.f32 %v1038_v33, %v673_v23 }
 0x3a6   : > { %v1040_v34 = vpop.eup %1039 }
 0x3a7   : > { %v726_v36 = vmul.f32 %v1040_v34, %v676_v25 }
 0x3a9   : > { %v727_v37 = vpack.c.bf16 %v726_v36, %v725_v35 }
 0x3ab   : > { %990 = vmatmul.mubr.msk.bf16.vlgmr.msra.gmra.mxu0 %vm194_vm2, %v727_v37 }
 0x46b   : > { %v781_v40 = vpop.f32.mrf.mxu0 }
 0x46c   : > { %v794_v41 = vadd.f32 %v907_v39, %v781_v40 }
 0x46d   : > { %v991_v43 = vpop.f32.mrf.mxu0 }
 0x46e   : > { %v903_v44 = vpack.c.bf16 %v794_v41, %v794_v41 }
 0x46f   : > { %v784_v45 = vpop.f32.mrf.mxu0 }
 0x470   : > { %804 = vst.msk [vmem:[%s789_s2] sm:$0xf] %vm266_vm3, %v903_v44  ;;  %v795_v46 = vadd.f32 %v908_v42, %v784_v45 }
 0x471   : > { %v992_v47 = vpop.f32.mrf.mxu0 }
 0x472   : > { %v904_v48 = vpack.c.bf16 %v795_v46, %v795_v46 }
 0x474   : > { %805 = vst.msk [vmem:[%s789_s2 + $0x4] sm:$0xf] %vm266_vm3, %v904_v48 }
 0x475 PF: > { %s509_s12 = sadd.s32 1, %s1249_s12  }
 0x476   : > { %p506_p13 = scmp.ge.s32.totalorder %s509_s12, 2  }
 0x477   :  { %s1266_s26 = smov (%p506_p13), [#allocation21]  }
 0x478   :  { %508 = sbr.rel (!%p506_p13) target bundleno = 323 (0x143), region = 115  ;;  %s811_s27 = sshll.u32 (%p506_p13), %s1266_s26, 4  ;;  %s812_s27 = int_to_ptr.vmem [resolvable:$true] %s811_s27 }
 0x479   :  { %s1209_s4 = scalar_lea.vmem (%p506_p13), %s812_s27, 256  ;;  %p1214_p1 = scmp.lt.s32.totalorder (%p506_p13), %s812_s27, %s812_s27 }
 0x47a   :  { %p1210_p0 = scmp.ne.s32.totalorder (%p506_p13), %s812_s27, %s1209_s4  ;;  %p1215_p2 = scmp.lt.s32.totalorder (%p506_p13), %s1209_s4, %s1209_s4 }
 0x47c   :  { %p1216_p3 = por (%p506_p13), %p1215_p2, %p1214_p1 }
 0x47e   :  { %p1217_p4 = pnand %p1216_p3, %p1210_p0 }
 0x480   :  { %1220 = shalt.err (!%p1217_p4)
}
 0x481   :  { %817 = dma.vmem_to_hbm [thread:$0]  %s812_s27, 256, %s1492_s13, [#allocation9], %s1254_s0, %s1254_s0, %s1255_s16  }
 0x482   :  { %1245 = dma.done.wait [#allocation9], 256  }
 0x483   :  { %1246 = vsyncadd [#allocation9], 4294967040 }
 0x484   :  { %821 = vsyncpa [#allocation8], 1 }
 0x485   :  { %822 = vsyncpa [#allocation11], 1 }
 0x486   :  { %823 = vsyncpa [#allocation14], 1 }
 0x487   :  { %824 = vsyncpa [#allocation17], 1 }
 0x488   :  { %825 = vsyncpa [#allocation20], 1 }
 0x489   :  { %826 = vsyncpa [#allocation9], 1 }

</bundles_post_ra>
